<compile_context>
chip_gen: v5e
topology: v5e:2x2
jax: 0.10.0
libtpu: 0.0.40
codegen_flags: <defaults>
</compile_context>

<pallas_src>
import functools
import math

import jax
import jax.numpy as jnp
from jax.experimental import pallas as pl
from jax.experimental.pallas import tpu as pltpu


def _round_up(x, m):
    return ((x + m - 1) // m) * m


def _largest_divisor_leq(n, cap):
    cap = max(1, min(n, cap))
    for d in range(cap, 0, -1):
        if n % d == 0:
            return d
    return 1


def bcnet_kernel(v_ref, q_ref, wv_ref, bv_ref, wq_ref, bq_ref, hmat_ref, out_ref,
                 *, scale_q):
    """One (batch-block, HK-tile) grid step.

    v_ref:    (Bt, Nv_pad, v_dim)            f32
    q_ref:    (Bt, Nq_pad, q_dim)            f32
    wv_ref:   (v_dim, HKt)                   bf16
    bv_ref:   (1, HKt)                       f32
    wq_ref:   (q_dim, HKt)                   bf16
    bq_ref:   (1, HKt)                       f32
    hmat_ref: (h_out, HKt)                   bf16
    out_ref:  (Bt, Nr_pad, h_out * Ns_pad)   f32, accumulated over the HK grid axis
    """
    bt, nv, v_dim = v_ref.shape
    _, nq, q_dim = q_ref.shape
    h_out, hkt = hmat_ref.shape

    # v_net / q_net restricted to this HK tile: weight-norm'd Linear (+ bias) + ReLU.
    # bf16 operands feed the MXU; bias add / ReLU stay f32 (no bf16 VALU on v5e).
    v2 = v_ref[...].reshape(bt * nv, v_dim).astype(jnp.bfloat16)
    q2 = q_ref[...].reshape(bt * nq, q_dim).astype(jnp.bfloat16)
    v_ = jnp.maximum(
        jnp.dot(v2, wv_ref[...], preferred_element_type=jnp.float32) + bv_ref[...],
        0.0)
    q_ = jnp.maximum(
        jnp.dot(q2, wq_ref[...], preferred_element_type=jnp.float32) + bq_ref[...],
        0.0)
    v_ = v_.reshape(bt, nv, hkt)
    q_ = q_.reshape(bt, nq, hkt)

    # Hadamard-scale whichever side has fewer rows (less VALU work, smaller
    # materialized operand), contract the other side against it on the MXU.
    if scale_q:
        rows, side, ns = v_, q_, nq
    else:
        rows, side, ns = q_, v_, nv

    scaled = (hmat_ref[...].astype(jnp.float32)[None, :, None, :]
              * side[:, None, :, :]).astype(jnp.bfloat16)
    # ns is sublane-aligned (multiple of 8) -> the (h, ns) merge is layout-clean.
    scaled = scaled.reshape(bt, h_out * ns, hkt)

    # out[b, r, h*ns + s] = sum_k rows[b, r, k] * hmat[h, k] * side[b, s, k]
    # Batched A.B^T (contraction on the trailing k of both) -> native MXU pattern.
    partial = jnp.einsum('brk,bmk->brm', rows.astype(jnp.bfloat16), scaled,
                         preferred_element_type=jnp.float32)

    kt = pl.program_id(1)

    @pl.when(kt == 0)
    def _init():
        out_ref[...] = partial

    @pl.when(kt > 0)
    def _accumulate():
        out_ref[...] += partial


def _prepare_params(params):
    """Fold BCNet params into padded, kernel-friendly operands.

    * If HK is not a multiple of 128 it is padded up to one and the first spare
      column carries h_bias exactly through the bilinear contraction
      (relu(0 @ W + 1) == 1, zero pad columns contribute 0).
    * If HK is already lane-aligned, no extra 128-lane tile is added; h_bias is
      applied in the wrapper instead.
    * Matmul operands (wv, wq, hmat) are stored bf16; biases stay f32.
    """
    wv, bv, wq, bq, hmat, hbias = params
    hk = wv.shape[1]
    use_bias_col = (hk % 128 != 0)
    hk_pad = _round_up(hk + 1, 128) if use_bias_col else hk
    pad = hk_pad - hk

    wv_p = jnp.pad(wv, ((0, 0), (0, pad)))
    wq_p = jnp.pad(wq, ((0, 0), (0, pad)))
    bv_p = jnp.pad(bv, ((0, 0), (0, pad)))
    bq_p = jnp.pad(bq, ((0, 0), (0, pad)))
    hmat_p = jnp.pad(hmat, ((0, 0), (0, pad)))
    if use_bias_col:
        bv_p = bv_p.at[0, hk].set(1.0)
        bq_p = bq_p.at[0, hk].set(1.0)
        hmat_p = hmat_p.at[:, hk].set(hbias.reshape(-1))

    return (wv_p.astype(jnp.bfloat16), bv_p,
            wq_p.astype(jnp.bfloat16), bq_p,
            hmat_p.astype(jnp.bfloat16), use_bias_col)


def bcnet_forward(v, q, params):
    B, Nv, v_dim = v.shape
    _, Nq, q_dim = q.shape
    h_out = params[4].shape[0]
    hbias = params[5]

    wv_p, bv_p, wq_p, bq_p, hmat_p, bias_in_kernel = _prepare_params(params)
    HKp = wv_p.shape[1]

    # ---- orientation: Hadamard-scale the side with fewer rows -----------------
    scale_q = Nq <= Nv
    Ns, Nr = (Nq, Nv) if scale_q else (Nv, Nq)

    # ---- padding for clean (8, 128) layout -------------------------------------
    # rows side: sublane aligned.  scaled side: sublane aligned AND (when the extra
    # padding is cheap) chosen so h_out * Ns_pad is a multiple of 128 -> unmasked
    # full-lane output stores.
    Nr_pad = _round_up(Nr, 8)
    lane_unit = 128 // math.gcd(h_out, 128)
    ns_unit = lane_unit * 8 // math.gcd(lane_unit, 8)          # lcm(lane_unit, 8)
    if _round_up(Ns, ns_unit) > 4 * _round_up(Ns, 8):
        ns_unit = 8                       # alignment too costly; accept masked stores
    Ns_pad = _round_up(Ns, ns_unit)
    Nv_pad, Nq_pad = (Nr_pad, Ns_pad) if scale_q else (Ns_pad, Nr_pad)
    out_lanes = h_out * Ns_pad

    v_p = jnp.pad(v, ((0, 0), (0, Nv_pad - Nv), (0, 0))) if Nv_pad != Nv else v
    q_p = jnp.pad(q, ((0, 0), (0, Nq_pad - Nq), (0, 0))) if Nq_pad != Nq else q

    # ---- grid: batch blocks ("parallel") x HK tiles ("arbitrary" reduction) ----
    HKt = next(t for t in (512, 256, 128) if HKp % t == 0)
    n_kt = HKp // HKt
    # Fill the MXU M dimension (~256 rows) per step, but cap the per-step batch
    # block by a VMEM budget for the input/output blocks.
    per_batch_block_bytes = 4 * (Nr_pad * out_lanes + Nv_pad * v_dim + Nq_pad * q_dim)
    bt_cap = max(1, (8 * 1024 * 1024) // per_batch_block_bytes)
    Bt = _largest_divisor_leq(B, min(pl.cdiv(256, min(Nv_pad, Nq_pad)), bt_cap))
    grid_b = B // Bt

    # ---- explicit VMEM limit sized to the post-tiling working set --------------
    f32b, bf16b = 4, 2
    est = ((v_dim + q_dim + h_out) * HKt * bf16b * (1 if n_kt == 1 else 2)
           + 2 * 2 * HKt * f32b
           + 2 * Bt * (Nv_pad * v_dim + Nq_pad * q_dim) * f32b
           + 2 * Bt * Nr_pad * out_lanes * f32b
           + Bt * (Nv_pad + Nq_pad) * HKt * f32b
           + Bt * out_lanes * HKt * (f32b + bf16b))
    vmem_limit = int(min(max(2 * est, 32 * 1024 * 1024), 56 * 1024 * 1024))

    kernel = functools.partial(bcnet_kernel, scale_q=scale_q)

    def build_call(single_buffer_weights):
        # Weight tiles are invariant along the batch grid axis; when HK also fits in
        # a single tile they never change at all -> single-buffer them to halve
        # resident weight VMEM.  With n_kt > 1 they stream, so keep double buffering.
        w_kwargs = dict(pipeline_mode=pl.Buffered(1)) if single_buffer_weights else {}
        in_specs = [
            pl.BlockSpec((Bt, Nv_pad, v_dim), lambda b, kt: (b, 0, 0)),
            pl.BlockSpec((Bt, Nq_pad, q_dim), lambda b, kt: (b, 0, 0)),
            pl.BlockSpec((v_dim, HKt), lambda b, kt: (0, kt), **w_kwargs),
            pl.BlockSpec((1, HKt), lambda b, kt: (0, kt), **w_kwargs),
            pl.BlockSpec((q_dim, HKt), lambda b, kt: (0, kt), **w_kwargs),
            pl.BlockSpec((1, HKt), lambda b, kt: (0, kt), **w_kwargs),
            pl.BlockSpec((h_out, HKt), lambda b, kt: (0, kt), **w_kwargs),
        ]
        return pl.pallas_call(
            kernel,
            out_shape=jax.ShapeDtypeStruct((B, Nr_pad, out_lanes), jnp.float32),
            grid_spec=pltpu.PrefetchScalarGridSpec(
                num_scalar_prefetch=0,
                grid=(grid_b, n_kt),
                in_specs=in_specs,
                out_specs=pl.BlockSpec((Bt, Nr_pad, out_lanes),
                                       lambda b, kt: (b, 0, 0)),
            ),
            compiler_params=pltpu.CompilerParams(
                dimension_semantics=("parallel", "arbitrary"),
                vmem_limit_bytes=vmem_limit,
            ),
        )

    args = (v_p, q_p, wv_p, bv_p, wq_p, bq_p, hmat_p)
    single_buffer = (n_kt == 1)
    try:
        out_flat = jax.block_until_ready(build_call(single_buffer)(*args))
    except Exception:
        if not single_buffer:
            raise
        # pipeline_mode not supported by this Pallas build: fall back to defaults.
        out_flat = build_call(False)(*args)

    # ---- relayout back to the PyTorch logits layout (B, h_out, Nv, Nq) ---------
    out4 = out_flat.reshape(B, Nr_pad, h_out, Ns_pad)
    if scale_q:   # rows = v, scaled = q
        out = out4.transpose(0, 2, 1, 3)[:, :, :Nv, :Nq]
    else:         # rows = q, scaled = v
        out = out4.transpose(0, 2, 3, 1)[:, :, :Nv, :Nq]

    if not bias_in_kernel:
        out = out + hbias.reshape(1, h_out, 1, 1)
    return out


def bcnet_reference(v, q, params):
    """Pure-JAX f32 reference of the same forward pass for correctness checking."""
    wv, bv, wq, bq, hmat, hbias = params
    v_ = jax.nn.relu(v @ wv + bv)                         # (B, Nv, HK)
    q_ = jax.nn.relu(q @ wq + bq)                         # (B, Nq, HK)
    logits = jnp.einsum('hk,bvk,bqk->bhvq', hmat, v_, q_)
    return logits + hbias.reshape(1, -1, 1, 1)


if __name__ == "__main__":
    # Small shapes consistent with BCNet(v_dim, q_dim, h_dim, h_out, k=3), h_out <= 32.
    B, Nv, Nq = 2, 16, 8
    v_dim, q_dim, h_dim, k, h_out = 32, 32, 32, 3, 4
    HK = h_dim * k

    keys = jax.random.split(jax.random.PRNGKey(0), 8)
    v = jax.random.normal(keys[0], (B, Nv, v_dim), jnp.float32)
    q = jax.random.normal(keys[1], (B, Nq, q_dim), jnp.float32)

    # weight_norm(Linear, dim=None): W_eff = g * V / ||V||_F ; stored transposed (in, out).
    wv_raw = jax.random.normal(keys[2], (HK, v_dim), jnp.float32) * 0.1
    gv = jnp.float32(1.5)
    wv = (gv * wv_raw / jnp.linalg.norm(wv_raw)).T        # (v_dim, HK)
    bv = jax.random.normal(keys[3], (1, HK), jnp.float32) * 0.1

    wq_raw = jax.random.normal(keys[4], (HK, q_dim), jnp.float32) * 0.1
    gq = jnp.float32(0.8)
    wq = (gq * wq_raw / jnp.linalg.norm(wq_raw)).T        # (q_dim, HK)
    bq = jax.random.normal(keys[5], (1, HK), jnp.float32) * 0.1

    # h_mat: (1, h_out, 1, HK).normal_()  -> stored as (h_out, HK)
    # h_bias: (1, h_out, 1, 1).normal_()  -> stored as (1, h_out)
    hmat = jax.random.normal(keys[6], (h_out, HK), jnp.float32)
    hbias = jax.random.normal(keys[7], (1, h_out), jnp.float32)

    # TODO(synk): dropout (p=0.2 / p=0.5) is treated as identity (inference mode).
    params = (wv, bv, wq, bq, hmat, hbias)

    out = bcnet_forward(v, q, params)
    out = jax.block_until_ready(out)

    ref = bcnet_reference(v, q, params)
    assert out.shape == (B, h_out, Nv, Nq), out.shape
    # Tolerance loosened vs. the f32 kernel because matmul operands are bf16 inside
    # the kernel (f32 accumulation); typical error is ~5e-3, bound well under 5e-2.
    assert jnp.allclose(out, ref, atol=5e-2, rtol=5e-2), float(
        jnp.max(jnp.abs(out - ref)))
    print("KERNEL_OK")
</pallas_src>

<mosaic_0001>
module attributes {stable_mosaic.version = 11 : i64} {
  func.func @bcnet_kernel(%arg0: i32, %arg1: i32, %arg2: memref<2x16x32xf32, #tpu.memory_space<vmem>>, %arg3: memref<2x32x32xf32, #tpu.memory_space<vmem>>, %arg4: memref<32x128xbf16, #tpu.memory_space<vmem>>, %arg5: memref<1x128xf32, #tpu.memory_space<vmem>>, %arg6: memref<32x128xbf16, #tpu.memory_space<vmem>>, %arg7: memref<1x128xf32, #tpu.memory_space<vmem>>, %arg8: memref<4x128xbf16, #tpu.memory_space<vmem>>, %arg9: memref<2x16x128xf32, #tpu.memory_space<vmem>>) attributes {dimension_semantics = [#tpu.dimension_semantics<parallel>, #tpu.dimension_semantics<arbitrary>], iteration_bounds = array<i64: 1, 1>, scalar_prefetch = 0 : i64, scratch_operands = 0 : i64, tpu.core_type = #tpu.core_type<tc>, window_params = [{transform_indices = @transform_0, window_bounds = array<i64: 2, 16, 32>}, {transform_indices = @transform_1, window_bounds = array<i64: 2, 32, 32>}, {pipeline_mode = #tpu.pipeline_mode<synchronous>, transform_indices = @transform_2, window_bounds = array<i64: 32, 128>}, {pipeline_mode = #tpu.pipeline_mode<synchronous>, transform_indices = @transform_3, window_bounds = array<i64: 1, 128>}, {pipeline_mode = #tpu.pipeline_mode<synchronous>, transform_indices = @transform_4, window_bounds = array<i64: 32, 128>}, {pipeline_mode = #tpu.pipeline_mode<synchronous>, transform_indices = @transform_5, window_bounds = array<i64: 1, 128>}, {pipeline_mode = #tpu.pipeline_mode<synchronous>, transform_indices = @transform_6, window_bounds = array<i64: 4, 128>}, {transform_indices = @transform_7, window_bounds = array<i64: 2, 16, 128>}]} {
    %c0 = arith.constant 0 : index
    %c0_0 = arith.constant 0 : index
    %c0_1 = arith.constant 0 : index
    %0 = vector.load %arg2[%c0, %c0_0, %c0_1] : memref<2x16x32xf32, #tpu.memory_space<vmem>>, vector<2x16x32xf32>
    %1 = vector.shape_cast %0 : vector<2x16x32xf32> to vector<32x32xf32>
    %2 = arith.truncf %1 : vector<32x32xf32> to vector<32x32xbf16>
    %c0_2 = arith.constant 0 : index
    %c0_3 = arith.constant 0 : index
    %c0_4 = arith.constant 0 : index
    %3 = vector.load %arg3[%c0_2, %c0_3, %c0_4] : memref<2x32x32xf32, #tpu.memory_space<vmem>>, vector<2x32x32xf32>
    %4 = vector.shape_cast %3 : vector<2x32x32xf32> to vector<64x32xf32>
    %5 = arith.truncf %4 : vector<64x32xf32> to vector<64x32xbf16>
    %c0_5 = arith.constant 0 : index
    %c0_6 = arith.constant 0 : index
    %6 = vector.load %arg4[%c0_5, %c0_6] : memref<32x128xbf16, #tpu.memory_space<vmem>>, vector<32x128xbf16>
    %cst = arith.constant dense<0.000000e+00> : vector<32x128xf32>
    %7 = tpu.matmul %2, %6, %cst {dimension_numbers = #tpu.dot_dimension_numbers<[1], [0], [0], [1], [0, 0, 1, 1], [], []>} : vector<32x32xbf16>, vector<32x128xbf16>, vector<32x128xf32> -> vector<32x128xf32>
    %c0_7 = arith.constant 0 : index
    %c0_8 = arith.constant 0 : index
    %8 = vector.load %arg5[%c0_7, %c0_8] : memref<1x128xf32, #tpu.memory_space<vmem>>, vector<1x128xf32>
    %9 = vector.broadcast %8 : vector<1x128xf32> to vector<32x128xf32>
    %10 = arith.addf %7, %9 : vector<32x128xf32>
    %cst_9 = arith.constant 0.000000e+00 : f32
    %11 = vector.broadcast %cst_9 : f32 to vector<32x128xf32>
    %12 = arith.maximumf %10, %11 : vector<32x128xf32>
    %c0_10 = arith.constant 0 : index
    %c0_11 = arith.constant 0 : index
    %13 = vector.load %arg6[%c0_10, %c0_11] : memref<32x128xbf16, #tpu.memory_space<vmem>>, vector<32x128xbf16>
    %cst_12 = arith.constant dense<0.000000e+00> : vector<64x128xf32>
    %14 = tpu.matmul %5, %13, %cst_12 {dimension_numbers = #tpu.dot_dimension_numbers<[1], [0], [0], [1], [0, 0, 1, 1], [], []>} : vector<64x32xbf16>, vector<32x128xbf16>, vector<64x128xf32> -> vector<64x128xf32>
    %c0_13 = arith.constant 0 : index
    %c0_14 = arith.constant 0 : index
    %15 = vector.load %arg7[%c0_13, %c0_14] : memref<1x128xf32, #tpu.memory_space<vmem>>, vector<1x128xf32>
    %16 = vector.broadcast %15 : vector<1x128xf32> to vector<64x128xf32>
    %17 = arith.addf %14, %16 : vector<64x128xf32>
    %cst_15 = arith.constant 0.000000e+00 : f32
    %18 = vector.broadcast %cst_15 : f32 to vector<64x128xf32>
    %19 = arith.maximumf %17, %18 : vector<64x128xf32>
    %20 = vector.shape_cast %12 : vector<32x128xf32> to vector<2x16x128xf32>
    %21 = vector.shape_cast %19 : vector<64x128xf32> to vector<2x32x128xf32>
    %c0_16 = arith.constant 0 : index
    %c0_17 = arith.constant 0 : index
    %22 = vector.load %arg8[%c0_16, %c0_17] : memref<4x128xbf16, #tpu.memory_space<vmem>>, vector<4x128xbf16>
    %23 = arith.extf %22 : vector<4x128xbf16> to vector<4x128xf32>
    %24 = vector.shape_cast %23 : vector<4x128xf32> to vector<1x4x1x128xf32>
    %25 = vector.shape_cast %21 : vector<2x32x128xf32> to vector<2x1x32x128xf32>
    %26 = vector.broadcast %24 : vector<1x4x1x128xf32> to vector<2x4x32x128xf32>
    %27 = vector.broadcast %25 : vector<2x1x32x128xf32> to vector<2x4x32x128xf32>
    %28 = arith.mulf %26, %27 : vector<2x4x32x128xf32>
    %29 = arith.truncf %28 : vector<2x4x32x128xf32> to vector<2x4x32x128xbf16>
    %30 = vector.shape_cast %29 : vector<2x4x32x128xbf16> to vector<2x128x128xbf16>
    %31 = arith.truncf %20 : vector<2x16x128xf32> to vector<2x16x128xbf16>
    "tpu.trace_start"() <{level = 10 : i32, message = "brk,bmk->brm"}> : () -> ()
    %cst_18 = arith.constant dense<0.000000e+00> : vector<2x16x128xf32>
    %32 = tpu.matmul %31, %30, %cst_18 {dimension_numbers = #tpu.dot_dimension_numbers<[2], [2], [1], [1], [0, 0, 0, 1, 1, 1], [0], [0]>} : vector<2x16x128xbf16>, vector<2x128x128xbf16>, vector<2x16x128xf32> -> vector<2x16x128xf32>
    "tpu.trace_stop"() : () -> ()
    %c0_i32 = arith.constant 0 : i32
    %33 = arith.cmpi eq, %arg1, %c0_i32 : i32
    %34 = arith.extui %33 : i1 to i32
    %c0_i32_19 = arith.constant 0 : i32
    %35 = arith.cmpi ne, %34, %c0_i32_19 : i32
    scf.if %35 {
      %c0_22 = arith.constant 0 : index
      %c0_23 = arith.constant 0 : index
      %c0_24 = arith.constant 0 : index
      %39 = vector.load %arg9[%c0_22, %c0_23, %c0_24] : memref<2x16x128xf32, #tpu.memory_space<vmem>>, vector<2x16x128xf32>
      tpu.vector_store %arg9[%c0_22, %c0_23, %c0_24], %32 {strides = array<i32>} : memref<2x16x128xf32, #tpu.memory_space<vmem>>, vector<2x16x128xf32>,
    } else {
    }
    %c0_i32_20 = arith.constant 0 : i32
    %36 = arith.cmpi sgt, %arg1, %c0_i32_20 : i32
    %37 = arith.extui %36 : i1 to i32
    %c0_i32_21 = arith.constant 0 : i32
    %38 = arith.cmpi ne, %37, %c0_i32_21 : i32
    scf.if %38 {
      %c0_22 = arith.constant 0 : index
      %c0_23 = arith.constant 0 : index
      %c0_24 = arith.constant 0 : index
      %39 = vector.load %arg9[%c0_22, %c0_23, %c0_24] : memref<2x16x128xf32, #tpu.memory_space<vmem>>, vector<2x16x128xf32>
      %40 = arith.addf %39, %32 : vector<2x16x128xf32>
      %c0_25 = arith.constant 0 : index
      %c0_26 = arith.constant 0 : index
      %c0_27 = arith.constant 0 : index
      %41 = vector.load %arg9[%c0_25, %c0_26, %c0_27] : memref<2x16x128xf32, #tpu.memory_space<vmem>>, vector<2x16x128xf32>
      tpu.vector_store %arg9[%c0_25, %c0_26, %c0_27], %40 {strides = array<i32>} : memref<2x16x128xf32, #tpu.memory_space<vmem>>, vector<2x16x128xf32>,
    } else {
    }
    return
  }
  func.func @transform_0(%arg0: i32, %arg1: i32) -> (i32, i32, i32) {
    %c0_i32 = arith.constant 0 : i32
    %c0_i32_0 = arith.constant 0 : i32
    %c0_i32_1 = arith.constant 0 : i32
    return %arg0, %c0_i32, %c0_i32_0 : i32, i32, i32
  }
  func.func @transform_1(%arg0: i32, %arg1: i32) -> (i32, i32, i32) {
    %c0_i32 = arith.constant 0 : i32
    %c0_i32_0 = arith.constant 0 : i32
    %c0_i32_1 = arith.constant 0 : i32
    return %arg0, %c0_i32, %c0_i32_0 : i32, i32, i32
  }
  func.func @transform_2(%arg0: i32, %arg1: i32) -> (i32, i32) {
    %c0_i32 = arith.constant 0 : i32
    %c0_i32_0 = arith.constant 0 : i32
    return %c0_i32, %arg1 : i32, i32
  }
  func.func @transform_3(%arg0: i32, %arg1: i32) -> (i32, i32) {
    %c0_i32 = arith.constant 0 : i32
    %c0_i32_0 = arith.constant 0 : i32
    return %c0_i32, %arg1 : i32, i32
  }
  func.func @transform_4(%arg0: i32, %arg1: i32) -> (i32, i32) {
    %c0_i32 = arith.constant 0 : i32
    %c0_i32_0 = arith.constant 0 : i32
    return %c0_i32, %arg1 : i32, i32
  }
  func.func @transform_5(%arg0: i32, %arg1: i32) -> (i32, i32) {
    %c0_i32 = arith.constant 0 : i32
    %c0_i32_0 = arith.constant 0 : i32
    return %c0_i32, %arg1 : i32, i32
  }
  func.func @transform_6(%arg0: i32, %arg1: i32) -> (i32, i32) {
    %c0_i32 = arith.constant 0 : i32
    %c0_i32_0 = arith.constant 0 : i32
    return %c0_i32, %arg1 : i32, i32
  }
  func.func @transform_7(%arg0: i32, %arg1: i32) -> (i32, i32, i32) {
    %c0_i32 = arith.constant 0 : i32
    %c0_i32_0 = arith.constant 0 : i32
    %c0_i32_1 = arith.constant 0 : i32
    return %arg0, %c0_i32, %c0_i32_0 : i32, i32, i32
  }
}

module attributes {stable_mosaic.version = 11 : i64} {
  func.func @bcnet_kernel(%arg0: i32, %arg1: i32, %arg2: memref<2x16x32xf32, #tpu.memory_space<vmem>>, %arg3: memref<2x32x32xf32, #tpu.memory_space<vmem>>, %arg4: memref<32x128xbf16, #tpu.memory_space<vmem>>, %arg5: memref<1x128xf32, #tpu.memory_space<vmem>>, %arg6: memref<32x128xbf16, #tpu.memory_space<vmem>>, %arg7: memref<1x128xf32, #tpu.memory_space<vmem>>, %arg8: memref<4x128xbf16, #tpu.memory_space<vmem>>, %arg9: memref<2x16x128xf32, #tpu.memory_space<vmem>>) attributes {dimension_semantics = [#tpu.dimension_semantics<parallel>, #tpu.dimension_semantics<arbitrary>], iteration_bounds = array<i64: 1, 1>, scalar_prefetch = 0 : i64, scratch_operands = 0 : i64, tpu.core_type = #tpu.core_type<tc>, window_params = [{transform_indices = @transform_0, window_bounds = array<i64: 2, 16, 32>}, {transform_indices = @transform_1, window_bounds = array<i64: 2, 32, 32>}, {transform_indices = @transform_2, window_bounds = array<i64: 32, 128>}, {transform_indices = @transform_3, window_bounds = array<i64: 1, 128>}, {transform_indices = @transform_4, window_bounds = array<i64: 32, 128>}, {transform_indices = @transform_5, window_bounds = array<i64: 1, 128>}, {transform_indices = @transform_6, window_bounds = array<i64: 4, 128>}, {transform_indices = @transform_7, window_bounds = array<i64: 2, 16, 128>}]} {
    %c0 = arith.constant 0 : index
    %c0_0 = arith.constant 0 : index
    %c0_1 = arith.constant 0 : index
    %0 = vector.load %arg2[%c0, %c0_0, %c0_1] : memref<2x16x32xf32, #tpu.memory_space<vmem>>, vector<2x16x32xf32>
    %1 = vector.shape_cast %0 : vector<2x16x32xf32> to vector<32x32xf32>
    %2 = arith.truncf %1 : vector<32x32xf32> to vector<32x32xbf16>
    %c0_2 = arith.constant 0 : index
    %c0_3 = arith.constant 0 : index
    %c0_4 = arith.constant 0 : index
    %3 = vector.load %arg3[%c0_2, %c0_3, %c0_4] : memref<2x32x32xf32, #tpu.memory_space<vmem>>, vector<2x32x32xf32>
    %4 = vector.shape_cast %3 : vector<2x32x32xf32> to vector<64x32xf32>
    %5 = arith.truncf %4 : vector<64x32xf32> to vector<64x32xbf16>
    %c0_5 = arith.constant 0 : index
    %c0_6 = arith.constant 0 : index
    %6 = vector.load %arg4[%c0_5, %c0_6] : memref<32x128xbf16, #tpu.memory_space<vmem>>, vector<32x128xbf16>
    %cst = arith.constant dense<0.000000e+00> : vector<32x128xf32>
    %7 = tpu.matmul %2, %6, %cst {dimension_numbers = #tpu.dot_dimension_numbers<[1], [0], [0], [1], [0, 0, 1, 1], [], []>} : vector<32x32xbf16>, vector<32x128xbf16>, vector<32x128xf32> -> vector<32x128xf32>
    %c0_7 = arith.constant 0 : index
    %c0_8 = arith.constant 0 : index
    %8 = vector.load %arg5[%c0_7, %c0_8] : memref<1x128xf32, #tpu.memory_space<vmem>>, vector<1x128xf32>
    %9 = vector.broadcast %8 : vector<1x128xf32> to vector<32x128xf32>
    %10 = arith.addf %7, %9 : vector<32x128xf32>
    %cst_9 = arith.constant 0.000000e+00 : f32
    %11 = vector.broadcast %cst_9 : f32 to vector<32x128xf32>
    %12 = arith.maximumf %10, %11 : vector<32x128xf32>
    %c0_10 = arith.constant 0 : index
    %c0_11 = arith.constant 0 : index
    %13 = vector.load %arg6[%c0_10, %c0_11] : memref<32x128xbf16, #tpu.memory_space<vmem>>, vector<32x128xbf16>
    %cst_12 = arith.constant dense<0.000000e+00> : vector<64x128xf32>
    %14 = tpu.matmul %5, %13, %cst_12 {dimension_numbers = #tpu.dot_dimension_numbers<[1], [0], [0], [1], [0, 0, 1, 1], [], []>} : vector<64x32xbf16>, vector<32x128xbf16>, vector<64x128xf32> -> vector<64x128xf32>
    %c0_13 = arith.constant 0 : index
    %c0_14 = arith.constant 0 : index
    %15 = vector.load %arg7[%c0_13, %c0_14] : memref<1x128xf32, #tpu.memory_space<vmem>>, vector<1x128xf32>
    %16 = vector.broadcast %15 : vector<1x128xf32> to vector<64x128xf32>
    %17 = arith.addf %14, %16 : vector<64x128xf32>
    %cst_15 = arith.constant 0.000000e+00 : f32
    %18 = vector.broadcast %cst_15 : f32 to vector<64x128xf32>
    %19 = arith.maximumf %17, %18 : vector<64x128xf32>
    %20 = vector.shape_cast %12 : vector<32x128xf32> to vector<2x16x128xf32>
    %21 = vector.shape_cast %19 : vector<64x128xf32> to vector<2x32x128xf32>
    %c0_16 = arith.constant 0 : index
    %c0_17 = arith.constant 0 : index
    %22 = vector.load %arg8[%c0_16, %c0_17] : memref<4x128xbf16, #tpu.memory_space<vmem>>, vector<4x128xbf16>
    %23 = arith.extf %22 : vector<4x128xbf16> to vector<4x128xf32>
    %24 = vector.shape_cast %23 : vector<4x128xf32> to vector<1x4x1x128xf32>
    %25 = vector.shape_cast %21 : vector<2x32x128xf32> to vector<2x1x32x128xf32>
    %26 = vector.broadcast %24 : vector<1x4x1x128xf32> to vector<2x4x32x128xf32>
    %27 = vector.broadcast %25 : vector<2x1x32x128xf32> to vector<2x4x32x128xf32>
    %28 = arith.mulf %26, %27 : vector<2x4x32x128xf32>
    %29 = arith.truncf %28 : vector<2x4x32x128xf32> to vector<2x4x32x128xbf16>
    %30 = vector.shape_cast %29 : vector<2x4x32x128xbf16> to vector<2x128x128xbf16>
    %31 = arith.truncf %20 : vector<2x16x128xf32> to vector<2x16x128xbf16>
    "tpu.trace_start"() <{level = 10 : i32, message = "brk,bmk->brm"}> : () -> ()
    %cst_18 = arith.constant dense<0.000000e+00> : vector<2x16x128xf32>
    %32 = tpu.matmul %31, %30, %cst_18 {dimension_numbers = #tpu.dot_dimension_numbers<[2], [2], [1], [1], [0, 0, 0, 1, 1, 1], [0], [0]>} : vector<2x16x128xbf16>, vector<2x128x128xbf16>, vector<2x16x128xf32> -> vector<2x16x128xf32>
    "tpu.trace_stop"() : () -> ()
    %c0_i32 = arith.constant 0 : i32
    %33 = arith.cmpi eq, %arg1, %c0_i32 : i32
    %34 = arith.extui %33 : i1 to i32
    %c0_i32_19 = arith.constant 0 : i32
    %35 = arith.cmpi ne, %34, %c0_i32_19 : i32
    scf.if %35 {
      %c0_22 = arith.constant 0 : index
      %c0_23 = arith.constant 0 : index
      %c0_24 = arith.constant 0 : index
      %39 = vector.load %arg9[%c0_22, %c0_23, %c0_24] : memref<2x16x128xf32, #tpu.memory_space<vmem>>, vector<2x16x128xf32>
      tpu.vector_store %arg9[%c0_22, %c0_23, %c0_24], %32 {strides = array<i32>} : memref<2x16x128xf32, #tpu.memory_space<vmem>>, vector<2x16x128xf32>,
    } else {
    }
    %c0_i32_20 = arith.constant 0 : i32
    %36 = arith.cmpi sgt, %arg1, %c0_i32_20 : i32
    %37 = arith.extui %36 : i1 to i32
    %c0_i32_21 = arith.constant 0 : i32
    %38 = arith.cmpi ne, %37, %c0_i32_21 : i32
    scf.if %38 {
      %c0_22 = arith.constant 0 : index
      %c0_23 = arith.constant 0 : index
      %c0_24 = arith.constant 0 : index
      %39 = vector.load %arg9[%c0_22, %c0_23, %c0_24] : memref<2x16x128xf32, #tpu.memory_space<vmem>>, vector<2x16x128xf32>
      %40 = arith.addf %39, %32 : vector<2x16x128xf32>
      %c0_25 = arith.constant 0 : index
      %c0_26 = arith.constant 0 : index
      %c0_27 = arith.constant 0 : index
      %41 = vector.load %arg9[%c0_25, %c0_26, %c0_27] : memref<2x16x128xf32, #tpu.memory_space<vmem>>, vector<2x16x128xf32>
      tpu.vector_store %arg9[%c0_25, %c0_26, %c0_27], %40 {strides = array<i32>} : memref<2x16x128xf32, #tpu.memory_space<vmem>>, vector<2x16x128xf32>,
    } else {
    }
    return
  }
  func.func @transform_0(%arg0: i32, %arg1: i32) -> (i32, i32, i32) {
    %c0_i32 = arith.constant 0 : i32
    %c0_i32_0 = arith.constant 0 : i32
    %c0_i32_1 = arith.constant 0 : i32
    return %arg0, %c0_i32, %c0_i32_0 : i32, i32, i32
  }
  func.func @transform_1(%arg0: i32, %arg1: i32) -> (i32, i32, i32) {
    %c0_i32 = arith.constant 0 : i32
    %c0_i32_0 = arith.constant 0 : i32
    %c0_i32_1 = arith.constant 0 : i32
    return %arg0, %c0_i32, %c0_i32_0 : i32, i32, i32
  }
  func.func @transform_2(%arg0: i32, %arg1: i32) -> (i32, i32) {
    %c0_i32 = arith.constant 0 : i32
    %c0_i32_0 = arith.constant 0 : i32
    return %c0_i32, %arg1 : i32, i32
  }
  func.func @transform_3(%arg0: i32, %arg1: i32) -> (i32, i32) {
    %c0_i32 = arith.constant 0 : i32
    %c0_i32_0 = arith.constant 0 : i32
    return %c0_i32, %arg1 : i32, i32
  }
  func.func @transform_4(%arg0: i32, %arg1: i32) -> (i32, i32) {
    %c0_i32 = arith.constant 0 : i32
    %c0_i32_0 = arith.constant 0 : i32
    return %c0_i32, %arg1 : i32, i32
  }
  func.func @transform_5(%arg0: i32, %arg1: i32) -> (i32, i32) {
    %c0_i32 = arith.constant 0 : i32
    %c0_i32_0 = arith.constant 0 : i32
    return %c0_i32, %arg1 : i32, i32
  }
  func.func @transform_6(%arg0: i32, %arg1: i32) -> (i32, i32) {
    %c0_i32 = arith.constant 0 : i32
    %c0_i32_0 = arith.constant 0 : i32
    return %c0_i32, %arg1 : i32, i32
  }
  func.func @transform_7(%arg0: i32, %arg1: i32) -> (i32, i32, i32) {
    %c0_i32 = arith.constant 0 : i32
    %c0_i32_0 = arith.constant 0 : i32
    %c0_i32_1 = arith.constant 0 : i32
    return %arg0, %c0_i32, %c0_i32_0 : i32, i32, i32
  }
}

</mosaic_0001>

<bundles_post_ra>
// kernel: tpu_custom_call.1
= control target key start
LH: loop header
LB: loop body
LE: loop exit
PB: predicated region body
PF: predicated region fallthrough
CT: control target
= control target key end

     0   :  { %12 = vsyncpa [#allocation3], 0  ;;  %s860_s0 = inlined_call_operand.hbm [shape: f32[2,16,32], index: 0, kind: input, shape index: {}]   ;;  %s861_s1 = inlined_call_operand.hbm [shape: f32[2,32,32], index: 1, kind: input, shape index: {}]   ;;  %s862_s2 = inlined_call_operand.hbm [shape: bf16[32,128], index: 2, kind: input, shape index: {}]   ;;  %s863_s3 = inlined_call_operand.vmem [shape: f32[1,128], index: 3, kind: input, shape index: {}]   ;;  %s864_s4 = inlined_call_operand.hbm [shape: bf16[32,128], index: 4, kind: input, shape index: {}]   ;;  %s865_s5 = inlined_call_operand.vmem [shape: f32[1,128], index: 5, kind: input, shape index: {}]   ;;  %s866_s6 = inlined_call_operand.vmem [shape: bf16[4,128], index: 6, kind: input, shape index: {}]   ;;  %s867_s7 = inlined_call_operand.hbm [shape: f32[2,16,128], index: 7, kind: output, shape index: {}]  }
   0x1   :  { %13 = vsyncpa [#allocation6], 0 }
   0x2   :  { %14 = vsyncpa [#allocation9], 0 }
   0x3   :  { %15 = vsyncpa [#allocation4], 0  ;;  %s33_s26 = sshll.u32 %s861_s1, 4  ;;  %s665_s27 = smov [#allocation5]   ;;  %s34_s26 = int_to_ptr.hbm [resolvable:$true] %s33_s26 }
   0x4   :  { %s35_s28 = sshll.u32 %s665_s27, 4  ;;  %s20_s8 = sshll.u32 %s860_s0, 4  ;;  %s36_s28 = int_to_ptr.vmem [resolvable:$true] %s35_s28  ;;  %s21_s8 = int_to_ptr.hbm [resolvable:$true] %s20_s8 }
   0x5   :  { %s666_s9 = smov 128   ;;  %s667_s10 = smov 8  }
   0x6   :  { %41 = dma.hbm_to_vmem [thread:$0]  %s34_s26, 1024, %s36_s28, [#allocation6], %s666_s9, %s666_s9, %s667_s10  }
   0x7   :  { %s668_s11 = smov [#allocation2]   ;;  %s46_s1 = sshll.u32 %s862_s2, 4  ;;  %s47_s1 = int_to_ptr.hbm [resolvable:$true] %s46_s1 }
   0x8   :  { %s22_s12 = sshll.u32 %s668_s11, 4  ;;  %s669_s0 = smov [#allocation7]   ;;  %s23_s12 = int_to_ptr.vmem [resolvable:$true] %s22_s12 }
   0x9   :  { %28 = dma.hbm_to_vmem [thread:$0]  %s21_s8, 512, %s23_s12, [#allocation3], %s666_s9, %s666_s9, %s667_s10  }
   0xa   :  { %s48_s15 = sshll.u32 %s669_s0, 4  ;;  %s61_s18 = sshll.u32 %s864_s4, 4  ;;  %s49_s15 = int_to_ptr.vmem [resolvable:$true] %s48_s15  ;;  %s62_s18 = int_to_ptr.hbm [resolvable:$true] %s61_s18 }
   0xb   :  { %s670_s19 = smov 64   ;;  %s671_s20 = smov 4  }
   0xc   :  { %54 = dma.hbm_to_vmem [thread:$0]  %s47_s1, 256, %s49_s15, [#allocation6], %s670_s19, %s670_s19, %s671_s20  }
   0xd   :  { %s672_s21 = smov [#allocation8]  }
   0xe   :  { %s63_s22 = sshll.u32 %s672_s21, 4  ;;  %s64_s22 = int_to_ptr.vmem [resolvable:$true] %s63_s22 }
   0xf   :  { %69 = dma.hbm_to_vmem [thread:$0]  %s62_s18, 256, %s64_s22, [#allocation9], %s670_s19, %s670_s19, %s671_s20  }
  0x10   :  { %657 = dma.done.wait [#allocation3], 512  }
  0x11   :  { %658 = vsyncadd [#allocation3], 4294966784 }
  0x12   :  { %659 = dma.done.wait [#allocation6], 1280  }
  0x13   :  { %660 = vsyncadd [#allocation6], 4294966016 }
  0x14   :  { %661 = dma.done.wait [#allocation9], 256  }
  0x15   :  { %662 = vsyncadd [#allocation9], 4294967040  ;;  %v525_v0 = vld [vmem:[#allocation8 + $0x8] sm:$0xff]  ;;  %v524_v1 = vld [vmem:[#allocation8] sm:$0xff]  ;;  %vm129_vm0 = vcmask 261120   ;;  %vm240_vm1 = vcmask 1043459  }
  0x16   :  { %197 = vmatpush.bf16.msra.mxu1 %v525_v0  ;;  %v97_v2 = vld [vmem:[#allocation5] sm:$0xff]  ;;  %v98_v3 = vld [vmem:[#allocation5 + $0x8] sm:$0xff]  ;;  %v99_v5 = vld [vmem:[#allocation5 + $0x10] sm:$0xff]  ;;  %vm237_vm2 = vcmask 1042434   ;;  %vm234_vm3 = vcmask 1041409   ;;  %vm232_vm4 = vcmask 1040384  }
  0x17   :  { %v105_v4 = vpack.c.bf16 %v98_v3, %v97_v2  ;;  %v100_v6 = vld [vmem:[#allocation5 + $0x18] sm:$0xff]  ;;  %v523_v8 = vld [vmem:[#allocation7 + $0x8] sm:$0xff]  ;;  %v522_v9 = vld [vmem:[#allocation7] sm:$0xff]  ;;  %s485_s28 = sshll.u32 %s867_s7, 4  ;;  %s486_s28 = int_to_ptr.hbm [resolvable:$true] %s485_s28 }
  0x18   :  { %v106_v7 = vpack.c.bf16 %v100_v6, %v99_v5  ;;  %142 = vmatpush.bf16.msra.mxu0 %v523_v8  ;;  %v91_v10 = vld [vmem:[#allocation2] sm:$0xff]  ;;  %v92_v11 = vld [vmem:[#allocation2 + $0x8] sm:$0xff]  ;;  %v93_v16 = vld [vmem:[#allocation2 + $0x10] sm:$0xff] }
  0x19   :  { %v95_v12 = vpack.c.bf16 %v92_v11, %v91_v10  ;;  %v101_v13 = vld [vmem:[#allocation5 + $0x20] sm:$0xff]  ;;  %v102_v14 = vld [vmem:[#allocation5 + $0x28] sm:$0xff]  ;;  %v94_v17 = vld [vmem:[#allocation2 + $0x18] sm:$0xff] }
  0x1a   :  { %198 = vmatpush.bf16.msra.mxu1 %v524_v1  ;;  %v107_v15 = vpack.c.bf16 %v102_v14, %v101_v13  ;;  %v96_v18 = vpack.c.bf16 %v94_v17, %v93_v16  ;;  %v103_v19 = vld [vmem:[#allocation5 + $0x30] sm:$0xff]  ;;  %v104_v20 = vld [vmem:[#allocation5 + $0x38] sm:$0xff]  ;;  %v228_v23 = vld [vmem:[%s866_s6] sm:$0x3] }
  0x1b   :  { %v108_v21 = vpack.c.bf16 %v104_v20, %v103_v19  ;;  %v741_v25 = vunpack.c.l.bf16 %v228_v23  ;;  %v535_v27 = vld [vmem:[%s865_s5] ss:$0 sm:$0xff] }
  0x1c   :  { %143 = vmatpush.bf16.msra.mxu0 %v522_v9 }
  0x1d   :  { %518 = vmatmul.msk.bf16.vlgmr.msra.gmra.mxu1 %vm129_vm0, %v105_v4  ;;  %v744_v26 = vrot.slane %v741_v25, 3 }
  0x1f   :  { %508 = vmatmul.msk.bf16.vlgmr.msra.gmra.mxu0 %vm129_vm0, %v95_v12  ;;  %v241_v29 = vsel %vm240_vm1, %v741_v25, %v744_v26  ;;  %v238_v44 = vsel %vm237_vm2, %v741_v25, %v744_v26  ;;  %v235_v0 = vsel %vm234_vm3, %v741_v25, %v744_v26 }
  0x20   :  { %v242_v31 = vrot.slane %v241_v29, 3  ;;  %v239_v51 = vrot.slane %v238_v44, 2 }
  0x22   :  { %v753_v34 = vperm.slane %v242_v31, 0  ;;  %v771_v55 = vperm.slane %v239_v51, 0 }
  0x2d   :  { %519 = vmatmul.msk.bf16.gmra.mxu1 %vm129_vm0, %v106_v7  ;;  %v236_v7 = vrot.slane %v235_v0, 1 }
  0x2f   :  { %509 = vmatmul.msk.bf16.gmra.mxu0 %vm129_vm0, %v96_v18  ;;  %v785_v12 = vperm.slane %v236_v7, 0 }
  0x3d   :  { %520 = vmatmul.msk.bf16.gmra.mxu1 %vm129_vm0, %v107_v15 }
  0x4d   :  { %521 = vmatmul.msk.bf16.gmra.mxu1 %vm129_vm0, %v108_v21 }
  0x9a   :  { %v200_v22 = vpop.f32.mrf.mxu1 }
  0x9b   :  { %v201_v36 = vadd.f32 %v535_v27, %v200_v22 }
  0x9c   :  { %v145_v51 = vpop.f32.mrf.mxu0 }
  0x9d   :  { %v761_v41 = vmax.f32 %v201_v36, 0.0 }
  0x9f   :  { %v263_v50 = vmul.f32 %v753_v34, %v761_v41  ;;  %v259_v4 = vmul.f32 %v771_v55, %v761_v41 }
  0xa1   :  { %v295_v54 = vpack.c.bf16 %v263_v50, %v263_v50  ;;  %v291_v10 = vpack.c.bf16 %v259_v4, %v259_v4 }
  0xa2   :  { %v202_v24 = vpop.f32.mrf.mxu1 }
  0xa3   :  { %v203_v33 = vadd.f32 %v535_v27, %v202_v24  ;;  %v353_v59 = vunpack.c.l.b16 %v295_v54  ;;  %v349_v17 = vunpack.c.l.b16 %v291_v10 }
  0xa5   :  { %v757_v39 = vmax.f32 %v203_v33, 0.0 }
  0xa7   :  { %v264_v46 = vmul.f32 %v753_v34, %v757_v39  ;;  %v260_v2 = vmul.f32 %v771_v55, %v757_v39  ;;  %v256_v36 = vmul.f32 %v785_v12, %v757_v39 }
  0xa9   :  { %v296_v53 = vpack.c.bf16 %v264_v46, %v264_v46  ;;  %v292_v9 = vpack.c.bf16 %v260_v2, %v260_v2  ;;  %v233_v46 = vsel %vm232_vm4, %v741_v25, %v744_v26 }
  0xaa   :  { %v205_v28 = vpop.f32.mrf.mxu1  ;;  %v811_v54 = vperm.slane %v233_v46, 0 }
  0xab   :  { %v206_v30 = vadd.f32 %v535_v27, %v205_v28  ;;  %v354_v56 = vunpack.c.l.b16 %v296_v53  ;;  %v350_v14 = vunpack.c.l.b16 %v292_v9 }
  0xad   :  { %v751_v32 = vmax.f32 %v206_v30, 0.0  ;;  %v363_v61 = vpack.c.b16 %v354_v56, %v353_v59  ;;  %v361_v24 = vpack.c.b16 %v350_v14, %v349_v17 }
  0xaf   :  { %v265_v38 = vmul.f32 %v753_v34, %v751_v32  ;;  %v261_v60 = vmul.f32 %v771_v55, %v751_v32  ;;  %v257_v20 = vmul.f32 %v785_v12, %v751_v32  ;;  %v253_v59 = vmul.f32 %v811_v54, %v751_v32 }
  0xb0   :  { %v252_v32 = vmul.f32 %v811_v54, %v757_v39 }
  0xb1   :  { %v297_v43 = vpack.c.bf16 %v265_v38, %v265_v38  ;;  %v293_v63 = vpack.c.bf16 %v261_v60, %v261_v60  ;;  %v289_v30 = vpack.c.bf16 %v257_v20, %v257_v20  ;;  %v255_v38 = vmul.f32 %v785_v12, %v761_v41 }
  0xb2   :  { %v207_v35 = vpop.f32.mrf.mxu1  ;;  %v284_v17 = vpack.c.bf16 %v252_v32, %v252_v32 }
  0xb3   :  { %v208_v37 = vadd.f32 %v535_v27, %v207_v35  ;;  %v355_v48 = vunpack.c.l.b16 %v297_v43  ;;  %v351_v6 = vunpack.c.l.b16 %v293_v63 }
  0xb5   :  { %v759_v40 = vmax.f32 %v208_v37, 0.0 }
  0xb7   :  { %v266_v42 = vmul.f32 %v753_v34, %v759_v40  ;;  %v262_v57 = vmul.f32 %v771_v55, %v759_v40  ;;  %v258_v15 = vmul.f32 %v785_v12, %v759_v40 }
  0xb9   :  { %v298_v45 = vpack.c.bf16 %v266_v42, %v266_v42  ;;  %v294_v62 = vpack.c.bf16 %v262_v57, %v262_v57  ;;  %v290_v28 = vpack.c.bf16 %v258_v15, %v258_v15  ;;  %v347_v42 = vunpack.c.l.b16 %v289_v30 }
  0xba   :  { %v210_v47 = vpop.f32.mrf.mxu1 }
  0xbb   :  { %v356_v49 = vunpack.c.l.b16 %v298_v45  ;;  %v352_v1 = vunpack.c.l.b16 %v294_v62  ;;  %v211_v18 = vadd.f32 %v535_v27, %v210_v47  ;;  %v348_v33 = vunpack.c.l.b16 %v290_v28 }
  0xbd   :  { %v364_v52 = vpack.c.b16 %v356_v49, %v355_v48  ;;  %v362_v8 = vpack.c.b16 %v352_v1, %v351_v6  ;;  %v797_v29 = vmax.f32 %v211_v18, 0.0  ;;  %v360_v47 = vpack.c.b16 %v348_v33, %v347_v42  ;;  %v824_v1 = vld [vmem:[%s863_s3] ss:$0 sm:$0xff]  ;;  %s673_s3 = smov [#allocation10]  }
  0xbe   :  { %v288_v49 = vpack.c.bf16 %v256_v36, %v256_v36  ;;  %v146_v7 = vadd.f32 %v824_v1, %v145_v51  ;;  %s483_s25 = sshll.u32 %s673_s3, 4  ;;  %s484_s25 = int_to_ptr.vmem [resolvable:$true] %s483_s25 }
  0xbf   :  { %373 = vmatpush.bf16.xpose.msra.mxu2 %v364_v52  ;;  %v279_v45 = vmul.f32 %v753_v34, %v797_v29  ;;  %v287_v52 = vpack.c.bf16 %v255_v38, %v255_v38  ;;  %v275_v14 = vmul.f32 %v771_v55, %v797_v29 }
  0xc0   :  { %v346_v56 = vunpack.c.l.b16 %v288_v49  ;;  %v155_v39 = vmax.f32 %v146_v7, 0.0 }
  0xc1   :  { %v311_v53 = vpack.c.bf16 %v279_v45, %v279_v45  ;;  %v345_v25 = vunpack.c.l.b16 %v287_v52 }
  0xc2   :  { %v212_v58 = vpop.f32.mrf.mxu1 }
  0xc3   :  { %v213_v13 = vadd.f32 %v535_v27, %v212_v58  ;;  %v254_v58 = vmul.f32 %v811_v54, %v759_v40  ;;  %v421_v26 = vunpack.c.l.b16 %v311_v53  ;;  %v285_v40 = vpack.c.bf16 %v253_v59, %v253_v59 }
  0xc5   :  { %v793_v22 = vmax.f32 %v213_v13, 0.0  ;;  %v286_v63 = vpack.c.bf16 %v254_v58, %v254_v58  ;;  %v343_v9 = vunpack.c.l.b16 %v285_v40  ;;  %v251_v13 = vmul.f32 %v811_v54, %v761_v41 }
  0xc7   :  { %374 = vmatpush.bf16.xpose.msra.mxu2 %v363_v61  ;;  %v280_v37 = vmul.f32 %v753_v34, %v793_v22  ;;  %v359_v61 = vpack.c.b16 %v346_v56, %v345_v25  ;;  %v344_v4 = vunpack.c.l.b16 %v286_v63  ;;  %v276_v6 = vmul.f32 %v771_v55, %v793_v22 }
  0xc8   :  { %v283_v20 = vpack.c.bf16 %v251_v13, %v251_v13  ;;  %v272_v45 = vmul.f32 %v785_v12, %v793_v22 }
  0xc9   :  { %v312_v50 = vpack.c.bf16 %v280_v37, %v280_v37  ;;  %v358_v15 = vpack.c.b16 %v344_v4, %v343_v9  ;;  %v308_v18 = vpack.c.bf16 %v276_v6, %v276_v6 }
  0xca   :  { %v215_v3 = vpop.f32.mrf.mxu1 }
  0xcb   :  { %v216_v5 = vadd.f32 %v535_v27, %v215_v3  ;;  %v422_v57 = vunpack.c.l.b16 %v312_v50  ;;  %v147_v3 = vpop.f32.mrf.mxu0  ;;  %v418_v28 = vunpack.c.l.b16 %v308_v18  ;;  %v304_v50 = vpack.c.bf16 %v272_v45, %v272_v45 }
  0xcd   :  { %v783_v11 = vmax.f32 %v216_v5, 0.0  ;;  %v431_v62 = vpack.c.b16 %v422_v57, %v421_v26  ;;  %v414_v53 = vunpack.c.l.b16 %v304_v50 }
  0xcf   :  { %375 = vmatpush.bf16.xpose.msra.mxu2 %v362_v8  ;;  %v281_v21 = vmul.f32 %v753_v34, %v783_v11  ;;  %v277_v60 = vmul.f32 %v771_v55, %v783_v11  ;;  %v148_v8 = vadd.f32 %v824_v1, %v147_v3  ;;  %v269_v58 = vmul.f32 %v811_v54, %v783_v11 }
  0xd1   :  { %v309_v2 = vpack.c.bf16 %v277_v60, %v277_v60  ;;  %v301_v26 = vpack.c.bf16 %v269_v58, %v269_v58  ;;  %v268_v60 = vmul.f32 %v811_v54, %v793_v22 }
  0xd2   :  { %v217_v16 = vpop.f32.mrf.mxu1 }
  0xd3   :  { %v218_v19 = vadd.f32 %v535_v27, %v217_v16  ;;  %v313_v27 = vpack.c.bf16 %v281_v21, %v281_v21  ;;  %v419_v10 = vunpack.c.l.b16 %v309_v2  ;;  %v307_v21 = vpack.c.bf16 %v275_v14, %v275_v14  ;;  %v150_v51 = vpop.f32.mrf.mxu0 }
  0xd4   :  { %v151_v63 = vadd.f32 %v824_v1, %v150_v51  ;;  %v300_v40 = vpack.c.bf16 %v268_v60, %v268_v60 }
  0xd5   :  { %v795_v23 = vmax.f32 %v218_v19, 0.0  ;;  %v423_v43 = vunpack.c.l.b16 %v313_v27  ;;  %v156_v19 = vmax.f32 %v148_v8, 0.0  ;;  %v341_v27 = vunpack.c.l.b16 %v283_v20 }
  0xd6   :  { %v417_v33 = vunpack.c.l.b16 %v307_v21  ;;  %v157_v2 = vmax.f32 %v151_v63, 0.0  ;;  %v410_v4 = vunpack.c.l.b16 %v300_v40 }
  0xd7   :  { %376 = vmatpush.bf16.xpose.msra.mxu2 %v361_v24  ;;  %v282_v31 = vmul.f32 %v753_v34, %v795_v23  ;;  %v278_v34 = vmul.f32 %v771_v55, %v795_v23  ;;  %v342_v24 = vunpack.c.l.b16 %v284_v17  ;;  %v274_v30 = vmul.f32 %v785_v12, %v795_v23 }
  0xd8   :  { %v316_v41 = vpack.c.bf16 %v156_v19, %v156_v19  ;;  %v273_v55 = vmul.f32 %v785_v12, %v783_v11  ;;  %v429_v36 = vpack.c.b16 %v418_v28, %v417_v33  ;;  %v270_v56 = vmul.f32 %v811_v54, %v795_v23 }
  0xd9   :  { %v314_v35 = vpack.c.bf16 %v282_v31, %v282_v31  ;;  %v310_v0 = vpack.c.bf16 %v278_v34, %v278_v34  ;;  %v315_v31 = vpack.c.bf16 %v155_v39, %v155_v39  ;;  %v306_v37 = vpack.c.bf16 %v274_v30, %v274_v30 }
  0xda   :  { %v322_v42 = vunpack.c.l.b16 %v316_v41  ;;  %v302_v25 = vpack.c.bf16 %v270_v56, %v270_v56  ;;  %v317_v32 = vpack.c.bf16 %v157_v2, %v157_v2 }
  0xdb   :  { %v424_v44 = vunpack.c.l.b16 %v314_v35  ;;  %v420_v5 = vunpack.c.l.b16 %v310_v0  ;;  %v357_v35 = vpack.c.b16 %v342_v24, %v341_v27  ;;  %v321_v38 = vunpack.c.l.b16 %v315_v31  ;;  %v152_v59 = vpop.f32.mrf.mxu0 }
  0xdc   :  { %v153_v23 = vadd.f32 %v824_v1, %v152_v59  ;;  %v389_v22 = vunpack.c.l.b16 %v317_v32 }
  0xdd   :  { %v432_v48 = vpack.c.b16 %v424_v44, %v423_v43  ;;  %v430_v16 = vpack.c.b16 %v420_v5, %v419_v10  ;;  %v305_v43 = vpack.c.bf16 %v273_v55, %v273_v55  ;;  %v416_v44 = vunpack.c.l.b16 %v306_v37 }
  0xde   :  { %v323_v46 = vpack.c.b16 %v322_v42, %v321_v38  ;;  %v158_v3 = vmax.f32 %v153_v23, 0.0 }
  0xdf   :  { %377 = vmatpush.bf16.xpose.msra.mxu2 %v360_v47  ;;  %441 = vmatpush.bf16.xpose.msra.mxu3 %v432_v48  ;;  %v415_v47 = vunpack.c.l.b16 %v305_v43  ;;  %v271_v48 = vmul.f32 %v785_v12, %v797_v29  ;;  %v412_v12 = vunpack.c.l.b16 %v302_v25 }
  0xe0   :  { %v318_v6 = vpack.c.bf16 %v158_v3, %v158_v3 }
  0xe1   :  { %v428_v49 = vpack.c.b16 %v416_v44, %v415_v47  ;;  %v303_v52 = vpack.c.bf16 %v271_v48, %v271_v48 }
  0xe2   :  { %v390_v8 = vunpack.c.l.b16 %v318_v6 }
  0xe3   :  { %v413_v57 = vunpack.c.l.b16 %v303_v52 }
  0xe4   :  { %v391_v9 = vpack.c.b16 %v390_v8, %v389_v22 }
  0xe5   :  { %v427_v34 = vpack.c.b16 %v414_v53, %v413_v57 }
  0xe7   :  { %378 = vmatpush.bf16.xpose.msra.mxu2 %v359_v61  ;;  %442 = vmatpush.bf16.xpose.msra.mxu3 %v431_v62  ;;  %v411_v61 = vunpack.c.l.b16 %v301_v26  ;;  %v267_v62 = vmul.f32 %v811_v54, %v797_v29 }
  0xe9   :  { %v426_v0 = vpack.c.b16 %v412_v12, %v411_v61  ;;  %v299_v11 = vpack.c.bf16 %v267_v62, %v267_v62 }
  0xeb   :  { %v409_v5 = vunpack.c.l.b16 %v299_v11 }
  0xed   :  { %v425_v7 = vpack.c.b16 %v410_v4, %v409_v5 }
  0xef   :  { %379 = vmatpush.bf16.xpose.msra.mxu2 %v358_v15  ;;  %443 = vmatpush.bf16.xpose.msra.mxu3 %v430_v16 }
  0xf7   :  { %380 = vmatpush.bf16.xpose.msra.mxu2 %v357_v35  ;;  %444 = vmatpush.bf16.xpose.msra.mxu3 %v429_v36 }
  0xfe   :  { %381 = vmatmul.bf16.vlgmr.msra.gmra.mxu2 %v323_v46 }
  0xff   :  { %445 = vmatpush.bf16.xpose.msra.mxu3 %v428_v49 }
 0x107   :  { %446 = vmatpush.bf16.xpose.msra.mxu3 %v427_v34 }
 0x10f   :  { %447 = vmatpush.bf16.xpose.msra.mxu3 %v426_v0 }
 0x117   :  { %448 = vmatpush.bf16.xpose.msra.mxu3 %v425_v7 }
 0x11e   :  { %449 = vmatmul.bf16.vlgmr.msra.gmra.mxu3 %v391_v9 }
 0x181   :  { %v382_v29 = vpop.f32.mrf.mxu2 }
 0x182   :  { %459 = vst [vmem:[#allocation10] sm:$0xff] %v382_v29 }
 0x189   :  { %v384_v54 = vpop.f32.mrf.mxu2 }
 0x18a   :  { %460 = vst [vmem:[#allocation10 + $0x8] sm:$0xff] %v384_v54 }
 0x1a1   :  { %v450_v1 = vpop.f32.mrf.mxu3 }
 0x1a2   :  { %461 = vst [vmem:[#allocation10 + $0x10] sm:$0xff] %v450_v1 }
 0x1a9   :  { %v452_v10 = vpop.f32.mrf.mxu3 }
 0x1aa   :  { %462 = vst [vmem:[#allocation10 + $0x18] sm:$0xff] %v452_v10 }
 0x1ab   :  { %491 = dma.vmem_to_hbm [thread:$0]  %s484_s25, 512, %s486_s28, [#allocation4], %s666_s9, %s666_s9, %s667_s10  }
 0x1ac   :  { %663 = dma.done.wait [#allocation4], 512  }
 0x1ad   :  { %664 = vsyncadd [#allocation4], 4294966784 }
 0x1ae   :  { %496 = vsyncpa [#allocation3], 1 }
 0x1af   :  { %497 = vsyncpa [#allocation6], 1 }
 0x1b0   :  { %498 = vsyncpa [#allocation9], 1 }
 0x1b1   :  { %499 = vsyncpa [#allocation4], 1 }

// kernel: tpu_custom_call.1
= control target key start
LH: loop header
LB: loop body
LE: loop exit
PB: predicated region body
PF: predicated region fallthrough
CT: control target
= control target key end

     0   :  { %12 = vsyncpa [#allocation3], 0  ;;  %s860_s0 = inlined_call_operand.hbm [shape: f32[2,16,32], index: 0, kind: input, shape index: {}]   ;;  %s861_s1 = inlined_call_operand.hbm [shape: f32[2,32,32], index: 1, kind: input, shape index: {}]   ;;  %s862_s2 = inlined_call_operand.hbm [shape: bf16[32,128], index: 2, kind: input, shape index: {}]   ;;  %s863_s3 = inlined_call_operand.vmem [shape: f32[1,128], index: 3, kind: input, shape index: {}]   ;;  %s864_s4 = inlined_call_operand.hbm [shape: bf16[32,128], index: 4, kind: input, shape index: {}]   ;;  %s865_s5 = inlined_call_operand.vmem [shape: f32[1,128], index: 5, kind: input, shape index: {}]   ;;  %s866_s6 = inlined_call_operand.vmem [shape: bf16[4,128], index: 6, kind: input, shape index: {}]   ;;  %s867_s7 = inlined_call_operand.hbm [shape: f32[2,16,128], index: 7, kind: output, shape index: {}]  }
   0x1   :  { %13 = vsyncpa [#allocation6], 0 }
   0x2   :  { %14 = vsyncpa [#allocation9], 0 }
   0x3   :  { %15 = vsyncpa [#allocation4], 0  ;;  %s33_s26 = sshll.u32 %s861_s1, 4  ;;  %s665_s27 = smov [#allocation5]   ;;  %s34_s26 = int_to_ptr.hbm [resolvable:$true] %s33_s26 }
   0x4   :  { %s35_s28 = sshll.u32 %s665_s27, 4  ;;  %s20_s8 = sshll.u32 %s860_s0, 4  ;;  %s36_s28 = int_to_ptr.vmem [resolvable:$true] %s35_s28  ;;  %s21_s8 = int_to_ptr.hbm [resolvable:$true] %s20_s8 }
   0x5   :  { %s666_s9 = smov 128   ;;  %s667_s10 = smov 8  }
   0x6   :  { %41 = dma.hbm_to_vmem [thread:$0]  %s34_s26, 1024, %s36_s28, [#allocation6], %s666_s9, %s666_s9, %s667_s10  }
   0x7   :  { %s668_s11 = smov [#allocation2]   ;;  %s46_s1 = sshll.u32 %s862_s2, 4  ;;  %s47_s1 = int_to_ptr.hbm [resolvable:$true] %s46_s1 }
   0x8   :  { %s22_s12 = sshll.u32 %s668_s11, 4  ;;  %s669_s0 = smov [#allocation7]   ;;  %s23_s12 = int_to_ptr.vmem [resolvable:$true] %s22_s12 }
   0x9   :  { %28 = dma.hbm_to_vmem [thread:$0]  %s21_s8, 512, %s23_s12, [#allocation3], %s666_s9, %s666_s9, %s667_s10  }
   0xa   :  { %s48_s15 = sshll.u32 %s669_s0, 4  ;;  %s61_s18 = sshll.u32 %s864_s4, 4  ;;  %s49_s15 = int_to_ptr.vmem [resolvable:$true] %s48_s15  ;;  %s62_s18 = int_to_ptr.hbm [resolvable:$true] %s61_s18 }
   0xb   :  { %s670_s19 = smov 64   ;;  %s671_s20 = smov 4  }
   0xc   :  { %54 = dma.hbm_to_vmem [thread:$0]  %s47_s1, 256, %s49_s15, [#allocation6], %s670_s19, %s670_s19, %s671_s20  }
   0xd   :  { %s672_s21 = smov [#allocation8]  }
   0xe   :  { %s63_s22 = sshll.u32 %s672_s21, 4  ;;  %s64_s22 = int_to_ptr.vmem [resolvable:$true] %s63_s22 }
   0xf   :  { %69 = dma.hbm_to_vmem [thread:$0]  %s62_s18, 256, %s64_s22, [#allocation9], %s670_s19, %s670_s19, %s671_s20  }
  0x10   :  { %657 = dma.done.wait [#allocation3], 512  }
  0x11   :  { %658 = vsyncadd [#allocation3], 4294966784 }
  0x12   :  { %659 = dma.done.wait [#allocation6], 1280  }
  0x13   :  { %660 = vsyncadd [#allocation6], 4294966016 }
  0x14   :  { %661 = dma.done.wait [#allocation9], 256  }
  0x15   :  { %662 = vsyncadd [#allocation9], 4294967040  ;;  %v525_v0 = vld [vmem:[#allocation8 + $0x8] sm:$0xff]  ;;  %v524_v1 = vld [vmem:[#allocation8] sm:$0xff]  ;;  %vm129_vm0 = vcmask 261120   ;;  %vm240_vm1 = vcmask 1043459  }
  0x16   :  { %197 = vmatpush.bf16.msra.mxu1 %v525_v0  ;;  %v97_v2 = vld [vmem:[#allocation5] sm:$0xff]  ;;  %v98_v3 = vld [vmem:[#allocation5 + $0x8] sm:$0xff]  ;;  %v99_v5 = vld [vmem:[#allocation5 + $0x10] sm:$0xff]  ;;  %vm237_vm2 = vcmask 1042434   ;;  %vm234_vm3 = vcmask 1041409   ;;  %vm232_vm4 = vcmask 1040384  }
  0x17   :  { %v105_v4 = vpack.c.bf16 %v98_v3, %v97_v2  ;;  %v100_v6 = vld [vmem:[#allocation5 + $0x18] sm:$0xff]  ;;  %v523_v8 = vld [vmem:[#allocation7 + $0x8] sm:$0xff]  ;;  %v522_v9 = vld [vmem:[#allocation7] sm:$0xff]  ;;  %s485_s28 = sshll.u32 %s867_s7, 4  ;;  %s486_s28 = int_to_ptr.hbm [resolvable:$true] %s485_s28 }
  0x18   :  { %v106_v7 = vpack.c.bf16 %v100_v6, %v99_v5  ;;  %142 = vmatpush.bf16.msra.mxu0 %v523_v8  ;;  %v91_v10 = vld [vmem:[#allocation2] sm:$0xff]  ;;  %v92_v11 = vld [vmem:[#allocation2 + $0x8] sm:$0xff]  ;;  %v93_v16 = vld [vmem:[#allocation2 + $0x10] sm:$0xff] }
  0x19   :  { %v95_v12 = vpack.c.bf16 %v92_v11, %v91_v10  ;;  %v101_v13 = vld [vmem:[#allocation5 + $0x20] sm:$0xff]  ;;  %v102_v14 = vld [vmem:[#allocation5 + $0x28] sm:$0xff]  ;;  %v94_v17 = vld [vmem:[#allocation2 + $0x18] sm:$0xff] }
  0x1a   :  { %198 = vmatpush.bf16.msra.mxu1 %v524_v1  ;;  %v107_v15 = vpack.c.bf16 %v102_v14, %v101_v13  ;;  %v96_v18 = vpack.c.bf16 %v94_v17, %v93_v16  ;;  %v103_v19 = vld [vmem:[#allocation5 + $0x30] sm:$0xff]  ;;  %v104_v20 = vld [vmem:[#allocation5 + $0x38] sm:$0xff]  ;;  %v228_v23 = vld [vmem:[%s866_s6] sm:$0x3] }
  0x1b   :  { %v108_v21 = vpack.c.bf16 %v104_v20, %v103_v19  ;;  %v741_v25 = vunpack.c.l.bf16 %v228_v23  ;;  %v535_v27 = vld [vmem:[%s865_s5] ss:$0 sm:$0xff] }
  0x1c   :  { %143 = vmatpush.bf16.msra.mxu0 %v522_v9 }
  0x1d   :  { %518 = vmatmul.msk.bf16.vlgmr.msra.gmra.mxu1 %vm129_vm0, %v105_v4  ;;  %v744_v26 = vrot.slane %v741_v25, 3 }
  0x1f   :  { %508 = vmatmul.msk.bf16.vlgmr.msra.gmra.mxu0 %vm129_vm0, %v95_v12  ;;  %v241_v29 = vsel %vm240_vm1, %v741_v25, %v744_v26  ;;  %v238_v44 = vsel %vm237_vm2, %v741_v25, %v744_v26  ;;  %v235_v0 = vsel %vm234_vm3, %v741_v25, %v744_v26 }
  0x20   :  { %v242_v31 = vrot.slane %v241_v29, 3  ;;  %v239_v51 = vrot.slane %v238_v44, 2 }
  0x22   :  { %v753_v34 = vperm.slane %v242_v31, 0  ;;  %v771_v55 = vperm.slane %v239_v51, 0 }
  0x2d   :  { %519 = vmatmul.msk.bf16.gmra.mxu1 %vm129_vm0, %v106_v7  ;;  %v236_v7 = vrot.slane %v235_v0, 1 }
  0x2f   :  { %509 = vmatmul.msk.bf16.gmra.mxu0 %vm129_vm0, %v96_v18  ;;  %v785_v12 = vperm.slane %v236_v7, 0 }
  0x3d   :  { %520 = vmatmul.msk.bf16.gmra.mxu1 %vm129_vm0, %v107_v15 }
  0x4d   :  { %521 = vmatmul.msk.bf16.gmra.mxu1 %vm129_vm0, %v108_v21 }
  0x9a   :  { %v200_v22 = vpop.f32.mrf.mxu1 }
  0x9b   :  { %v201_v36 = vadd.f32 %v535_v27, %v200_v22 }
  0x9c   :  { %v145_v51 = vpop.f32.mrf.mxu0 }
  0x9d   :  { %v761_v41 = vmax.f32 %v201_v36, 0.0 }
  0x9f   :  { %v263_v50 = vmul.f32 %v753_v34, %v761_v41  ;;  %v259_v4 = vmul.f32 %v771_v55, %v761_v41 }
  0xa1   :  { %v295_v54 = vpack.c.bf16 %v263_v50, %v263_v50  ;;  %v291_v10 = vpack.c.bf16 %v259_v4, %v259_v4 }
  0xa2   :  { %v202_v24 = vpop.f32.mrf.mxu1 }
  0xa3   :  { %v203_v33 = vadd.f32 %v535_v27, %v202_v24  ;;  %v353_v59 = vunpack.c.l.b16 %v295_v54  ;;  %v349_v17 = vunpack.c.l.b16 %v291_v10 }
  0xa5   :  { %v757_v39 = vmax.f32 %v203_v33, 0.0 }
  0xa7   :  { %v264_v46 = vmul.f32 %v753_v34, %v757_v39  ;;  %v260_v2 = vmul.f32 %v771_v55, %v757_v39  ;;  %v256_v36 = vmul.f32 %v785_v12, %v757_v39 }
  0xa9   :  { %v296_v53 = vpack.c.bf16 %v264_v46, %v264_v46  ;;  %v292_v9 = vpack.c.bf16 %v260_v2, %v260_v2  ;;  %v233_v46 = vsel %vm232_vm4, %v741_v25, %v744_v26 }
  0xaa   :  { %v205_v28 = vpop.f32.mrf.mxu1  ;;  %v811_v54 = vperm.slane %v233_v46, 0 }
  0xab   :  { %v206_v30 = vadd.f32 %v535_v27, %v205_v28  ;;  %v354_v56 = vunpack.c.l.b16 %v296_v53  ;;  %v350_v14 = vunpack.c.l.b16 %v292_v9 }
  0xad   :  { %v751_v32 = vmax.f32 %v206_v30, 0.0  ;;  %v363_v61 = vpack.c.b16 %v354_v56, %v353_v59  ;;  %v361_v24 = vpack.c.b16 %v350_v14, %v349_v17 }
  0xaf   :  { %v265_v38 = vmul.f32 %v753_v34, %v751_v32  ;;  %v261_v60 = vmul.f32 %v771_v55, %v751_v32  ;;  %v257_v20 = vmul.f32 %v785_v12, %v751_v32  ;;  %v253_v59 = vmul.f32 %v811_v54, %v751_v32 }
  0xb0   :  { %v252_v32 = vmul.f32 %v811_v54, %v757_v39 }
  0xb1   :  { %v297_v43 = vpack.c.bf16 %v265_v38, %v265_v38  ;;  %v293_v63 = vpack.c.bf16 %v261_v60, %v261_v60  ;;  %v289_v30 = vpack.c.bf16 %v257_v20, %v257_v20  ;;  %v255_v38 = vmul.f32 %v785_v12, %v761_v41 }
  0xb2   :  { %v207_v35 = vpop.f32.mrf.mxu1  ;;  %v284_v17 = vpack.c.bf16 %v252_v32, %v252_v32 }
  0xb3   :  { %v208_v37 = vadd.f32 %v535_v27, %v207_v35  ;;  %v355_v48 = vunpack.c.l.b16 %v297_v43  ;;  %v351_v6 = vunpack.c.l.b16 %v293_v63 }
  0xb5   :  { %v759_v40 = vmax.f32 %v208_v37, 0.0 }
  0xb7   :  { %v266_v42 = vmul.f32 %v753_v34, %v759_v40  ;;  %v262_v57 = vmul.f32 %v771_v55, %v759_v40  ;;  %v258_v15 = vmul.f32 %v785_v12, %v759_v40 }
  0xb9   :  { %v298_v45 = vpack.c.bf16 %v266_v42, %v266_v42  ;;  %v294_v62 = vpack.c.bf16 %v262_v57, %v262_v57  ;;  %v290_v28 = vpack.c.bf16 %v258_v15, %v258_v15  ;;  %v347_v42 = vunpack.c.l.b16 %v289_v30 }
  0xba   :  { %v210_v47 = vpop.f32.mrf.mxu1 }
  0xbb   :  { %v356_v49 = vunpack.c.l.b16 %v298_v45  ;;  %v352_v1 = vunpack.c.l.b16 %v294_v62  ;;  %v211_v18 = vadd.f32 %v535_v27, %v210_v47  ;;  %v348_v33 = vunpack.c.l.b16 %v290_v28 }
  0xbd   :  { %v364_v52 = vpack.c.b16 %v356_v49, %v355_v48  ;;  %v362_v8 = vpack.c.b16 %v352_v1, %v351_v6  ;;  %v797_v29 = vmax.f32 %v211_v18, 0.0  ;;  %v360_v47 = vpack.c.b16 %v348_v33, %v347_v42  ;;  %v824_v1 = vld [vmem:[%s863_s3] ss:$0 sm:$0xff]  ;;  %s673_s3 = smov [#allocation10]  }
  0xbe   :  { %v288_v49 = vpack.c.bf16 %v256_v36, %v256_v36  ;;  %v146_v7 = vadd.f32 %v824_v1, %v145_v51  ;;  %s483_s25 = sshll.u32 %s673_s3, 4  ;;  %s484_s25 = int_to_ptr.vmem [resolvable:$true] %s483_s25 }
  0xbf   :  { %373 = vmatpush.bf16.xpose.msra.mxu2 %v364_v52  ;;  %v279_v45 = vmul.f32 %v753_v34, %v797_v29  ;;  %v287_v52 = vpack.c.bf16 %v255_v38, %v255_v38  ;;  %v275_v14 = vmul.f32 %v771_v55, %v797_v29 }
  0xc0   :  { %v346_v56 = vunpack.c.l.b16 %v288_v49  ;;  %v155_v39 = vmax.f32 %v146_v7, 0.0 }
  0xc1   :  { %v311_v53 = vpack.c.bf16 %v279_v45, %v279_v45  ;;  %v345_v25 = vunpack.c.l.b16 %v287_v52 }
  0xc2   :  { %v212_v58 = vpop.f32.mrf.mxu1 }
  0xc3   :  { %v213_v13 = vadd.f32 %v535_v27, %v212_v58  ;;  %v254_v58 = vmul.f32 %v811_v54, %v759_v40  ;;  %v421_v26 = vunpack.c.l.b16 %v311_v53  ;;  %v285_v40 = vpack.c.bf16 %v253_v59, %v253_v59 }
  0xc5   :  { %v793_v22 = vmax.f32 %v213_v13, 0.0  ;;  %v286_v63 = vpack.c.bf16 %v254_v58, %v254_v58  ;;  %v343_v9 = vunpack.c.l.b16 %v285_v40  ;;  %v251_v13 = vmul.f32 %v811_v54, %v761_v41 }
  0xc7   :  { %374 = vmatpush.bf16.xpose.msra.mxu2 %v363_v61  ;;  %v280_v37 = vmul.f32 %v753_v34, %v793_v22  ;;  %v359_v61 = vpack.c.b16 %v346_v56, %v345_v25  ;;  %v344_v4 = vunpack.c.l.b16 %v286_v63  ;;  %v276_v6 = vmul.f32 %v771_v55, %v793_v22 }
  0xc8   :  { %v283_v20 = vpack.c.bf16 %v251_v13, %v251_v13  ;;  %v272_v45 = vmul.f32 %v785_v12, %v793_v22 }
  0xc9   :  { %v312_v50 = vpack.c.bf16 %v280_v37, %v280_v37  ;;  %v358_v15 = vpack.c.b16 %v344_v4, %v343_v9  ;;  %v308_v18 = vpack.c.bf16 %v276_v6, %v276_v6 }
  0xca   :  { %v215_v3 = vpop.f32.mrf.mxu1 }
  0xcb   :  { %v216_v5 = vadd.f32 %v535_v27, %v215_v3  ;;  %v422_v57 = vunpack.c.l.b16 %v312_v50  ;;  %v147_v3 = vpop.f32.mrf.mxu0  ;;  %v418_v28 = vunpack.c.l.b16 %v308_v18  ;;  %v304_v50 = vpack.c.bf16 %v272_v45, %v272_v45 }
  0xcd   :  { %v783_v11 = vmax.f32 %v216_v5, 0.0  ;;  %v431_v62 = vpack.c.b16 %v422_v57, %v421_v26  ;;  %v414_v53 = vunpack.c.l.b16 %v304_v50 }
  0xcf   :  { %375 = vmatpush.bf16.xpose.msra.mxu2 %v362_v8  ;;  %v281_v21 = vmul.f32 %v753_v34, %v783_v11  ;;  %v277_v60 = vmul.f32 %v771_v55, %v783_v11  ;;  %v148_v8 = vadd.f32 %v824_v1, %v147_v3  ;;  %v269_v58 = vmul.f32 %v811_v54, %v783_v11 }
  0xd1   :  { %v309_v2 = vpack.c.bf16 %v277_v60, %v277_v60  ;;  %v301_v26 = vpack.c.bf16 %v269_v58, %v269_v58  ;;  %v268_v60 = vmul.f32 %v811_v54, %v793_v22 }
  0xd2   :  { %v217_v16 = vpop.f32.mrf.mxu1 }
  0xd3   :  { %v218_v19 = vadd.f32 %v535_v27, %v217_v16  ;;  %v313_v27 = vpack.c.bf16 %v281_v21, %v281_v21  ;;  %v419_v10 = vunpack.c.l.b16 %v309_v2  ;;  %v307_v21 = vpack.c.bf16 %v275_v14, %v275_v14  ;;  %v150_v51 = vpop.f32.mrf.mxu0 }
  0xd4   :  { %v151_v63 = vadd.f32 %v824_v1, %v150_v51  ;;  %v300_v40 = vpack.c.bf16 %v268_v60, %v268_v60 }
  0xd5   :  { %v795_v23 = vmax.f32 %v218_v19, 0.0  ;;  %v423_v43 = vunpack.c.l.b16 %v313_v27  ;;  %v156_v19 = vmax.f32 %v148_v8, 0.0  ;;  %v341_v27 = vunpack.c.l.b16 %v283_v20 }
  0xd6   :  { %v417_v33 = vunpack.c.l.b16 %v307_v21  ;;  %v157_v2 = vmax.f32 %v151_v63, 0.0  ;;  %v410_v4 = vunpack.c.l.b16 %v300_v40 }
  0xd7   :  { %376 = vmatpush.bf16.xpose.msra.mxu2 %v361_v24  ;;  %v282_v31 = vmul.f32 %v753_v34, %v795_v23  ;;  %v278_v34 = vmul.f32 %v771_v55, %v795_v23  ;;  %v342_v24 = vunpack.c.l.b16 %v284_v17  ;;  %v274_v30 = vmul.f32 %v785_v12, %v795_v23 }
  0xd8   :  { %v316_v41 = vpack.c.bf16 %v156_v19, %v156_v19  ;;  %v273_v55 = vmul.f32 %v785_v12, %v783_v11  ;;  %v429_v36 = vpack.c.b16 %v418_v28, %v417_v33  ;;  %v270_v56 = vmul.f32 %v811_v54, %v795_v23 }
  0xd9   :  { %v314_v35 = vpack.c.bf16 %v282_v31, %v282_v31  ;;  %v310_v0 = vpack.c.bf16 %v278_v34, %v278_v34  ;;  %v315_v31 = vpack.c.bf16 %v155_v39, %v155_v39  ;;  %v306_v37 = vpack.c.bf16 %v274_v30, %v274_v30 }
  0xda   :  { %v322_v42 = vunpack.c.l.b16 %v316_v41  ;;  %v302_v25 = vpack.c.bf16 %v270_v56, %v270_v56  ;;  %v317_v32 = vpack.c.bf16 %v157_v2, %v157_v2 }
  0xdb   :  { %v424_v44 = vunpack.c.l.b16 %v314_v35  ;;  %v420_v5 = vunpack.c.l.b16 %v310_v0  ;;  %v357_v35 = vpack.c.b16 %v342_v24, %v341_v27  ;;  %v321_v38 = vunpack.c.l.b16 %v315_v31  ;;  %v152_v59 = vpop.f32.mrf.mxu0 }
  0xdc   :  { %v153_v23 = vadd.f32 %v824_v1, %v152_v59  ;;  %v389_v22 = vunpack.c.l.b16 %v317_v32 }
  0xdd   :  { %v432_v48 = vpack.c.b16 %v424_v44, %v423_v43  ;;  %v430_v16 = vpack.c.b16 %v420_v5, %v419_v10  ;;  %v305_v43 = vpack.c.bf16 %v273_v55, %v273_v55  ;;  %v416_v44 = vunpack.c.l.b16 %v306_v37 }
  0xde   :  { %v323_v46 = vpack.c.b16 %v322_v42, %v321_v38  ;;  %v158_v3 = vmax.f32 %v153_v23, 0.0 }
  0xdf   :  { %377 = vmatpush.bf16.xpose.msra.mxu2 %v360_v47  ;;  %441 = vmatpush.bf16.xpose.msra.mxu3 %v432_v48  ;;  %v415_v47 = vunpack.c.l.b16 %v305_v43  ;;  %v271_v48 = vmul.f32 %v785_v12, %v797_v29  ;;  %v412_v12 = vunpack.c.l.b16 %v302_v25 }
  0xe0   :  { %v318_v6 = vpack.c.bf16 %v158_v3, %v158_v3 }
  0xe1   :  { %v428_v49 = vpack.c.b16 %v416_v44, %v415_v47  ;;  %v303_v52 = vpack.c.bf16 %v271_v48, %v271_v48 }
  0xe2   :  { %v390_v8 = vunpack.c.l.b16 %v318_v6 }
  0xe3   :  { %v413_v57 = vunpack.c.l.b16 %v303_v52 }
  0xe4   :  { %v391_v9 = vpack.c.b16 %v390_v8, %v389_v22 }
  0xe5   :  { %v427_v34 = vpack.c.b16 %v414_v53, %v413_v57 }
  0xe7   :  { %378 = vmatpush.bf16.xpose.msra.mxu2 %v359_v61  ;;  %442 = vmatpush.bf16.xpose.msra.mxu3 %v431_v62  ;;  %v411_v61 = vunpack.c.l.b16 %v301_v26  ;;  %v267_v62 = vmul.f32 %v811_v54, %v797_v29 }
  0xe9   :  { %v426_v0 = vpack.c.b16 %v412_v12, %v411_v61  ;;  %v299_v11 = vpack.c.bf16 %v267_v62, %v267_v62 }
  0xeb   :  { %v409_v5 = vunpack.c.l.b16 %v299_v11 }
  0xed   :  { %v425_v7 = vpack.c.b16 %v410_v4, %v409_v5 }
  0xef   :  { %379 = vmatpush.bf16.xpose.msra.mxu2 %v358_v15  ;;  %443 = vmatpush.bf16.xpose.msra.mxu3 %v430_v16 }
  0xf7   :  { %380 = vmatpush.bf16.xpose.msra.mxu2 %v357_v35  ;;  %444 = vmatpush.bf16.xpose.msra.mxu3 %v429_v36 }
  0xfe   :  { %381 = vmatmul.bf16.vlgmr.msra.gmra.mxu2 %v323_v46 }
  0xff   :  { %445 = vmatpush.bf16.xpose.msra.mxu3 %v428_v49 }
 0x107   :  { %446 = vmatpush.bf16.xpose.msra.mxu3 %v427_v34 }
 0x10f   :  { %447 = vmatpush.bf16.xpose.msra.mxu3 %v426_v0 }
 0x117   :  { %448 = vmatpush.bf16.xpose.msra.mxu3 %v425_v7 }
 0x11e   :  { %449 = vmatmul.bf16.vlgmr.msra.gmra.mxu3 %v391_v9 }
 0x181   :  { %v382_v29 = vpop.f32.mrf.mxu2 }
 0x182   :  { %459 = vst [vmem:[#allocation10] sm:$0xff] %v382_v29 }
 0x189   :  { %v384_v54 = vpop.f32.mrf.mxu2 }
 0x18a   :  { %460 = vst [vmem:[#allocation10 + $0x8] sm:$0xff] %v384_v54 }
 0x1a1   :  { %v450_v1 = vpop.f32.mrf.mxu3 }
 0x1a2   :  { %461 = vst [vmem:[#allocation10 + $0x10] sm:$0xff] %v450_v1 }
 0x1a9   :  { %v452_v10 = vpop.f32.mrf.mxu3 }
 0x1aa   :  { %462 = vst [vmem:[#allocation10 + $0x18] sm:$0xff] %v452_v10 }
 0x1ab   :  { %491 = dma.vmem_to_hbm [thread:$0]  %s484_s25, 512, %s486_s28, [#allocation4], %s666_s9, %s666_s9, %s667_s10  }
 0x1ac   :  { %663 = dma.done.wait [#allocation4], 512  }
 0x1ad   :  { %664 = vsyncadd [#allocation4], 4294966784 }
 0x1ae   :  { %496 = vsyncpa [#allocation3], 1 }
 0x1af   :  { %497 = vsyncpa [#allocation6], 1 }
 0x1b0   :  { %498 = vsyncpa [#allocation9], 1 }
 0x1b1   :  { %499 = vsyncpa [#allocation4], 1 }

</bundles_post_ra>
